<compile_context>
chip_gen: v6e
topology: v6e:2x2x1
jax: 0.10.0
libtpu: 0.0.40
codegen_flags: <defaults>
</compile_context>

<pallas_src>
import jax
import jax.numpy as jnp
from jax.experimental import pallas as pl
from jax.experimental.pallas import tpu as pltpu


def _round_up(n, m):
    return ((n + m - 1) // m) * m


def _cdiv(a, b):
    return (a + b - 1) // b


def _sublane(dtype):
    # dtype-aware second-minor alignment: f32 -> 8, bf16/f16 -> 16, int8/fp8 -> 32.
    return {4: 8, 2: 16, 1: 32}.get(jnp.dtype(dtype).itemsize, 8)


def _vmem_budget_bytes():
    # Physical VMEM differs per generation (v5e/v6e: 128 MiB, v7x: 64 MiB).
    cap = 64 * 1024 * 1024  # conservative fallback == v7x physical
    try:
        info = pltpu.get_tpu_info()
        cap = int(getattr(info, "vmem_capacity_bytes", cap))
    except Exception:
        pass
    # Leave headroom for compiler-internal scratch, semaphores, etc.
    return int(cap * 0.70)


def _largest_128_divisor(n, cap):
    """Largest multiple of 128 dividing n (n is a multiple of 128), <= cap."""
    best, d = 128, 128
    while d <= min(n, cap):
        if n % d == 0:
            best = d
        d += 128
    return best


def _head_kernel_fullk(x_ref, w_ref, b_ref, o_ref):
    # Single MXU dot over the whole (padded) feature dim: no accumulator RMW,
    # no reduction grid axis, bias fused into the (lane-dense, unmasked) store.
    o_ref[...] = (
        jnp.dot(x_ref[...], w_ref[...], preferred_element_type=jnp.float32)
        + b_ref[...]
    ).astype(o_ref.dtype)


def _head_kernel_ksplit(x_ref, w_ref, b_ref, o_ref, acc_ref):
    # NOTE: correctness relies on the reduction axis (k) staying the innermost
    # ("arbitrary") grid axis so acc_ref is re-initialized at k == 0 for every
    # (i, j) output tile.
    k = pl.program_id(2)
    partial = jnp.dot(x_ref[...], w_ref[...], preferred_element_type=jnp.float32)

    @pl.when(k == 0)
    def _():
        acc_ref[...] = partial           # direct store: saves one acc read+write

    @pl.when(k > 0)
    def _():
        acc_ref[...] += partial

    @pl.when(k == pl.num_programs(2) - 1)
    def _():
        o_ref[...] = (acc_ref[...] + b_ref[...]).astype(o_ref.dtype)


class PallasClassifierHead:
    """ClassifierHead forward: dropout(rate=0 -> identity) followed by Linear.

    The static parameters are relaid-out and padded once at construction so each
    forward call streams W from HBM exactly once through the pallas_call pipeline.
    """

    def __init__(self, weight, bias, *, dropout_rate=0.0, tm_cap=512, tn_cap=512):
        # TODO(synk): dropout_rate > 0 would need pltpu.prng_seed +
        # pltpu.stateful_bernoulli masking of the x tiles; rate == 0 is identity.
        assert dropout_rate == 0.0, "only the module default (rate=0) is implemented"
        C, dim = weight.shape
        assert bias.shape == (C,)
        self.dim, self.num_classes = dim, C
        self.param_itemsize = jnp.dtype(weight.dtype).itemsize

        self.Kp = _round_up(dim, 128)
        self.Cp = _round_up(C, 128)
        self.tm_cap = tm_cap
        self.budget = _vmem_budget_bytes()

        # Lane-dense N tile dividing Cp. Force >= 2 N-tiles whenever Cp allows it so
        # a v7x chip (2 TensorCores, grid sharded over "parallel" axes) never idles
        # one core when the batch fits a single M tile; cost elsewhere is ~0.35us/step.
        tn_eff = tn_cap if self.Cp < 256 else min(tn_cap, self.Cp // 2)
        self.TN = _largest_128_divisor(self.Cp, max(128, tn_eff))

        def footprint(tm, tn, tk, ksplit):
            isz = self.param_itemsize
            f = 2 * tm * tk * isz          # x tiles   (double-buffered)
            f += 2 * tk * tn * isz         # W tiles   (double-buffered)
            f += 2 * 1 * tn * isz          # bias tiles
            f += 2 * tm * tn * isz         # output tiles
            if ksplit:
                f += tm * tn * 4           # f32 accumulator scratch
            return f
        self._footprint = footprint

        # Prefer collapsing K entirely (one dot per output tile, no reduction axis).
        if footprint(tm_cap, self.TN, self.Kp, ksplit=False) <= self.budget:
            self.TK = self.Kp
        else:
            tk, d = 128, 128
            while d <= self.Kp:
                if self.Kp % d == 0 and footprint(tm_cap, self.TN, d, True) <= self.budget:
                    tk = d
                d += 128
            self.TK = tk
        self.ksplit = self.TK < self.Kp

        # One-time relayout: [C, dim] -> padded [Kp, Cp]; zero K-padding contributes
        # nothing to the dot, zero C-padding is sliced away (only when needed).
        w_t = jnp.transpose(weight)                              # [dim, C]
        self.w_padded = jnp.pad(w_t, ((0, self.Kp - dim), (0, self.Cp - C)))
        self.b_padded = jnp.pad(bias, (0, self.Cp - C)).reshape(1, self.Cp)
        jax.block_until_ready((self.w_padded, self.b_padded))

    def __call__(self, x):
        B, dim = x.shape
        assert dim == self.dim
        sub = _sublane(x.dtype)

        # Minimal M padding: round B to the dtype sublane multiple, pick TM that
        # nearly divides it (never pad B all the way up to a fixed tile size).
        Bp0 = _round_up(B, sub)
        nM = _cdiv(Bp0, self.tm_cap)
        TM = _round_up(_cdiv(Bp0, nM), sub)
        Bp = nM * TM

        Kp, Cp, TK, TN = self.Kp, self.Cp, self.TK, self.TN
        nN = Cp // TN
        nK = Kp // TK

        xp = x
        if (Bp, Kp) != (B, dim):
            xp = jnp.pad(x, ((0, Bp - B), (0, Kp - dim)))

        isz = jnp.dtype(x.dtype).itemsize
        flops = 2 * Bp * Kp * Cp
        # Count grid revisits: x is re-streamed once per N tile, W once per M tile.
        bytes_accessed = (
            Bp * Kp * isz * nN
            + Kp * Cp * self.param_itemsize * nM
            + Cp * self.param_itemsize * nM
            + Bp * Cp * isz
        )
        cost = pl.CostEstimate(flops=flops, transcendentals=0,
                               bytes_accessed=bytes_accessed)

        fp = self._footprint(TM, TN, TK, self.ksplit)
        vmem_limit = min(max(int(fp * 1.5) + (2 << 20), 16 << 20), self.budget)

        if not self.ksplit:
            out = pl.pallas_call(
                _head_kernel_fullk,
                out_shape=jax.ShapeDtypeStruct((Bp, Cp), x.dtype),
                grid_spec=pltpu.PrefetchScalarGridSpec(
                    num_scalar_prefetch=0,
                    grid=(nM, nN),
                    in_specs=[
                        pl.BlockSpec((TM, Kp), lambda i, j: (i, 0)),   # x row-block, full K
                        pl.BlockSpec((Kp, TN), lambda i, j: (0, j)),   # W col-block, full K
                        pl.BlockSpec((1, TN), lambda i, j: (0, j)),    # bias block
                    ],
                    out_specs=pl.BlockSpec((TM, TN), lambda i, j: (i, j)),
                ),
                compiler_params=pltpu.CompilerParams(
                    dimension_semantics=("parallel", "parallel"),
                    vmem_limit_bytes=vmem_limit),
                cost_estimate=cost,
            )(xp, self.w_padded, self.b_padded)
        else:
            out = pl.pallas_call(
                _head_kernel_ksplit,
                out_shape=jax.ShapeDtypeStruct((Bp, Cp), x.dtype),
                grid_spec=pltpu.PrefetchScalarGridSpec(
                    num_scalar_prefetch=0,
                    grid=(nM, nN, nK),                                 # k innermost!
                    in_specs=[
                        pl.BlockSpec((TM, TK), lambda i, j, k: (i, k)),
                        pl.BlockSpec((TK, TN), lambda i, j, k: (k, j)),
                        pl.BlockSpec((1, TN), lambda i, j, k: (0, j)),
                    ],
                    out_specs=pl.BlockSpec((TM, TN), lambda i, j, k: (i, j)),
                    scratch_shapes=[pltpu.VMEM((TM, TN), jnp.float32)],
                ),
                compiler_params=pltpu.CompilerParams(
                    dimension_semantics=("parallel", "parallel", "arbitrary"),
                    vmem_limit_bytes=vmem_limit),
                cost_estimate=cost,
            )(xp, self.w_padded, self.b_padded)

        if (Bp, Cp) != (B, self.num_classes):
            out = out[:B, :self.num_classes]
        return out


if __name__ == "__main__":
    # Small shapes consistent with the module: dim=32 hidden, num_classes=16, batch=8.
    B, dim, num_classes = 8, 32, 16

    key = jax.random.PRNGKey(0)
    kx, kw, kb = jax.random.split(key, 3)

    x = jax.random.normal(kx, (B, dim), dtype=jnp.float32)
    # Deterministic init mimicking nn.Linear's uniform(-1/sqrt(dim), 1/sqrt(dim)).
    bound = 1.0 / (dim ** 0.5)
    weight = jax.random.uniform(kw, (num_classes, dim), jnp.float32, -bound, bound)
    bias = jax.random.uniform(kb, (num_classes,), jnp.float32, -bound, bound)

    head = PallasClassifierHead(weight, bias)   # one-time param relayout/pad
    out = head(x)
    jax.block_until_ready(out)

    # Correctness check against plain JAX reference.
    ref = x @ weight.T + bias
    assert out.shape == (B, num_classes)
    assert jnp.allclose(out, ref, atol=1e-5, rtol=1e-5), "mismatch vs reference"

    print("KERNEL_OK")
</pallas_src>

<mosaic_0001>
module attributes {stable_mosaic.version = 11 : i64} {
  func.func @_head_kernel_fullk(%arg0: i32, %arg1: i32, %arg2: memref<8x128xf32, #tpu.memory_space<vmem>>, %arg3: memref<128x128xf32, #tpu.memory_space<vmem>>, %arg4: memref<1x128xf32, #tpu.memory_space<vmem>>, %arg5: memref<8x128xf32, #tpu.memory_space<vmem>>) attributes {dimension_semantics = [#tpu.dimension_semantics<parallel>, #tpu.dimension_semantics<parallel>], iteration_bounds = array<i64: 1, 1>, scalar_prefetch = 0 : i64, scratch_operands = 0 : i64, tpu.core_type = #tpu.core_type<tc>, window_params = [{transform_indices = @transform_0, window_bounds = array<i64: 8, 128>}, {transform_indices = @transform_1, window_bounds = array<i64: 128, 128>}, {transform_indices = @transform_2, window_bounds = array<i64: 1, 128>}, {transform_indices = @transform_3, window_bounds = array<i64: 8, 128>}]} {
    %c0 = arith.constant 0 : index
    %c0_0 = arith.constant 0 : index
    %0 = vector.load %arg2[%c0, %c0_0] : memref<8x128xf32, #tpu.memory_space<vmem>>, vector<8x128xf32>
    %c0_1 = arith.constant 0 : index
    %c0_2 = arith.constant 0 : index
    %1 = vector.load %arg3[%c0_1, %c0_2] : memref<128x128xf32, #tpu.memory_space<vmem>>, vector<128x128xf32>
    %cst = arith.constant dense<0.000000e+00> : vector<8x128xf32>
    %2 = tpu.matmul %0, %1, %cst {dimension_numbers = #tpu.dot_dimension_numbers<[1], [0], [0], [1], [0, 0, 1, 1], [], []>} : vector<8x128xf32>, vector<128x128xf32>, vector<8x128xf32> -> vector<8x128xf32>
    %c0_3 = arith.constant 0 : index
    %c0_4 = arith.constant 0 : index
    %3 = vector.load %arg4[%c0_3, %c0_4] : memref<1x128xf32, #tpu.memory_space<vmem>>, vector<1x128xf32>
    %4 = vector.broadcast %3 : vector<1x128xf32> to vector<8x128xf32>
    %5 = arith.addf %2, %4 : vector<8x128xf32>
    %c0_5 = arith.constant 0 : index
    %c0_6 = arith.constant 0 : index
    %6 = vector.load %arg5[%c0_5, %c0_6] : memref<8x128xf32, #tpu.memory_space<vmem>>, vector<8x128xf32>
    tpu.vector_store %arg5[%c0_5, %c0_6], %5 {strides = array<i32>} : memref<8x128xf32, #tpu.memory_space<vmem>>, vector<8x128xf32>,
    return
  }
  func.func @transform_0(%arg0: i32, %arg1: i32) -> (i32, i32) {
    %c0_i32 = arith.constant 0 : i32
    %c0_i32_0 = arith.constant 0 : i32
    return %arg0, %c0_i32 : i32, i32
  }
  func.func @transform_1(%arg0: i32, %arg1: i32) -> (i32, i32) {
    %c0_i32 = arith.constant 0 : i32
    %c0_i32_0 = arith.constant 0 : i32
    return %c0_i32, %arg1 : i32, i32
  }
  func.func @transform_2(%arg0: i32, %arg1: i32) -> (i32, i32) {
    %c0_i32 = arith.constant 0 : i32
    %c0_i32_0 = arith.constant 0 : i32
    return %c0_i32, %arg1 : i32, i32
  }
  func.func @transform_3(%arg0: i32, %arg1: i32) -> (i32, i32) {
    %c0_i32 = arith.constant 0 : i32
    return %arg0, %arg1 : i32, i32
  }
}

</mosaic_0001>

<bundles_post_ra>
// kernel: tpu_custom_call.1
= control target key start
LH: loop header
LB: loop body
LE: loop exit
PB: predicated region body
PF: predicated region fallthrough
CT: control target
= control target key end

     0   :  { %8 = vsyncpa [#allocation3], 0  ;;  %s317_s0 = inlined_call_operand.hbm [shape: f32[8,128], index: 0, kind: input, shape index: {}]   ;;  %s318_s1 = inlined_call_operand.hbm [shape: f32[128,128], index: 1, kind: input, shape index: {}]   ;;  %s319_s2 = inlined_call_operand.vmem [shape: f32[1,128], index: 2, kind: input, shape index: {}]   ;;  %s320_s3 = inlined_call_operand.hbm [shape: f32[8,128], index: 3, kind: output, shape index: {}]  }
   0x1   :  { %9 = vsyncpa [#allocation6], 0 }
   0x2   :  { %10 = vsyncpa [#allocation4], 0  ;;  %s278_s12 = smov [#allocation2]   ;;  %s279_s14 = smov [#allocation5]  }
   0x3   :  { %s17_s13 = sshll.u32 %s278_s12, 4  ;;  %s26_s15 = sshll.u32 %s279_s14, 4  ;;  %s18_s13 = int_to_ptr.vmem [resolvable:$true] %s17_s13  ;;  %s27_s15 = int_to_ptr.vmem [resolvable:$true] %s26_s15 }
   0x4   :  { %s220_s16 = scalar_lea.vmem %s18_s13, 128  ;;  %p225_p1 = scmp.lt.s32.totalorder %s18_s13, %s18_s13 }
   0x5   :  { %p221_p0 = scmp.ne.s32.totalorder %s18_s13, %s220_s16  ;;  %p226_p2 = scmp.lt.s32.totalorder %s220_s16, %s220_s16 }
   0x7   :  { %p227_p3 = por %p226_p2, %p225_p1 }
   0x9   :  { %p228_p4 = pnand %p227_p3, %p221_p0 }
   0xb   :  { %231 = shalt.err (!%p228_p4)
}
   0xc   :  { %20 = dma.hbm_to_vmem [thread:$0]  %s317_s0, 128, %s18_s13, [#allocation3]  }
   0xd   :  { %s240_s19 = scalar_lea.vmem %s27_s15, 2048  ;;  %p245_p6 = scmp.lt.s32.totalorder %s27_s15, %s27_s15 }
   0xe   :  { %p241_p5 = scmp.ne.s32.totalorder %s27_s15, %s240_s19  ;;  %p246_p7 = scmp.lt.s32.totalorder %s240_s19, %s240_s19 }
  0x10   :  { %p247_p8 = por %p246_p7, %p245_p6 }
  0x12   :  { %p248_p9 = pnand %p247_p8, %p241_p5 }
  0x14   :  { %251 = shalt.err (!%p248_p9)
}
  0x15   :  { %s280_s20 = smov 128   ;;  %s281_s21 = smov 8  }
  0x16   :  { %32 = dma.hbm_to_vmem [thread:$0]  %s318_s1, 2048, %s27_s15, [#allocation6], %s280_s20, %s280_s20, %s281_s21  }
  0x17   :  { %272 = dma.done.wait [#allocation3], 128  }
  0x18   :  { %273 = vsyncadd [#allocation3], 4294967168 }
  0x19   :  { %274 = dma.done.wait [#allocation6], 2048  }
  0x1a   :  { %275 = vsyncadd [#allocation6], 4294965248  ;;  %v282_v0 = vmov 0.0   ;;  %vm283_vm0 = vmmov 0   ;;  %v57_v1 = vld [vmem:[#allocation5 + $0x78] sm:$0xff]  ;;  %v56_v2 = vld [vmem:[#allocation5 + $0x70] sm:$0xff] }
  0x1b   :  { %170 = vmatprep.subr.mxu0 %v282_v0  ;;  %202 = vmatprep.mubr.msk.f32.mxu0 %vm283_vm0, %v282_v0  ;;  %v55_v3 = vld [vmem:[#allocation5 + $0x68] sm:$0xff]  ;;  %v54_v4 = vld [vmem:[#allocation5 + $0x60] sm:$0xff]  ;;  %v53_v5 = vld [vmem:[#allocation5 + $0x58] sm:$0xff]  ;;  %s284_s24 = smov [#allocation7]  }
  0x1c   :  { %171 = vmatpush3.msra.mxu0 %v57_v1  ;;  %v52_v6 = vld [vmem:[#allocation5 + $0x50] sm:$0xff]  ;;  %v51_v7 = vld [vmem:[#allocation5 + $0x48] sm:$0xff]  ;;  %v50_v8 = vld [vmem:[#allocation5 + $0x40] sm:$0xff]  ;;  %s142_s25 = sshll.u32 %s284_s24, 4  ;;  %s143_s25 = int_to_ptr.vmem [resolvable:$true] %s142_s25 }
  0x1d   :  { %172 = vmatprep.subr.mxu0 %v282_v0  ;;  %v49_v9 = vld [vmem:[#allocation5 + $0x38] sm:$0xff]  ;;  %v48_v10 = vld [vmem:[#allocation5 + $0x30] sm:$0xff]  ;;  %v47_v11 = vld [vmem:[#allocation5 + $0x28] sm:$0xff]  ;;  %s252_s26 = scalar_lea.vmem %s143_s25, 128  ;;  %p257_p11 = scmp.lt.s32.totalorder %s143_s25, %s143_s25 }
  0x1e   :  { %173 = vmatpush3.msra.mxu0 %v56_v2  ;;  %v46_v12 = vld [vmem:[#allocation5 + $0x20] sm:$0xff]  ;;  %v45_v13 = vld [vmem:[#allocation5 + $0x18] sm:$0xff]  ;;  %v44_v14 = vld [vmem:[#allocation5 + $0x10] sm:$0xff]  ;;  %p253_p10 = scmp.ne.s32.totalorder %s143_s25, %s252_s26  ;;  %p258_p12 = scmp.lt.s32.totalorder %s252_s26, %s252_s26 }
  0x1f   :  { %174 = vmatprep.subr.mxu0 %v282_v0  ;;  %v43_v15 = vld [vmem:[#allocation5 + $0x8] sm:$0xff]  ;;  %v42_v16 = vld [vmem:[#allocation5] sm:$0xff]  ;;  %v41_v17 = vld [vmem:[#allocation2] sm:$0xff] }
  0x20   :  { %175 = vmatpush3.msra.mxu0 %v55_v3  ;;  %v152_v18 = vld [vmem:[%s319_s2] ss:$0 sm:$0xff]  ;;  %p259_p13 = por %p258_p12, %p257_p11 }
  0x21   :  { %176 = vmatprep.subr.mxu0 %v282_v0 }
  0x22   :  { %177 = vmatpush3.msra.mxu0 %v54_v4  ;;  %p260_p0 = pnand %p259_p13, %p253_p10 }
  0x23   :  { %178 = vmatprep.subr.mxu0 %v282_v0 }
  0x24   :  { %179 = vmatpush3.msra.mxu0 %v53_v5 }
  0x25   :  { %180 = vmatprep.subr.mxu0 %v282_v0 }
  0x26   :  { %181 = vmatpush3.msra.mxu0 %v52_v6 }
  0x27   :  { %182 = vmatprep.subr.mxu0 %v282_v0 }
  0x28   :  { %183 = vmatpush3.msra.mxu0 %v51_v7 }
  0x29   :  { %184 = vmatprep.subr.mxu0 %v282_v0 }
  0x2a   :  { %185 = vmatpush3.msra.mxu0 %v50_v8 }
  0x2b   :  { %186 = vmatprep.subr.mxu0 %v282_v0 }
  0x2c   :  { %187 = vmatpush3.msra.mxu0 %v49_v9 }
  0x2d   :  { %188 = vmatprep.subr.mxu0 %v282_v0 }
  0x2e   :  { %189 = vmatpush3.msra.mxu0 %v48_v10 }
  0x2f   :  { %190 = vmatprep.subr.mxu0 %v282_v0 }
  0x30   :  { %191 = vmatpush3.msra.mxu0 %v47_v11 }
  0x31   :  { %192 = vmatprep.subr.mxu0 %v282_v0 }
  0x32   :  { %193 = vmatpush3.msra.mxu0 %v46_v12 }
  0x33   :  { %194 = vmatprep.subr.mxu0 %v282_v0 }
  0x34   :  { %195 = vmatpush3.msra.mxu0 %v45_v13 }
  0x35   :  { %196 = vmatprep.subr.mxu0 %v282_v0 }
  0x36   :  { %197 = vmatpush3.msra.mxu0 %v44_v14 }
  0x37   :  { %198 = vmatprep.subr.mxu0 %v282_v0 }
  0x38   :  { %199 = vmatpush3.msra.mxu0 %v43_v15 }
  0x39   :  { %200 = vmatprep.subr.mxu0 %v282_v0 }
  0x3a   :  { %201 = vmatpush3.msra.mxu0 %v42_v16 }
  0x3b   :  { %203 = vmatmul.mubr.f32.vlgmr.msra.gmra.mxu0 %v41_v17 }
  0xfb   :  { %v131_v19 = vpop.f32.mrf.mxu0 }
  0xfc   :  { %v132_v20 = vadd.f32 %v152_v18, %v131_v19 }
  0xfd   :  { %v204_v21 = vpop.f32.mrf.mxu0 }
  0xfe   :  { %135 = vst [vmem:[#allocation7] sm:$0xff] %v132_v20 }
  0xff   :  { %263 = shalt.err (!%p260_p0)
}
 0x100   :  { %145 = dma.vmem_to_hbm [thread:$0]  %s143_s25, 128, %s320_s3, [#allocation4]  }
 0x101   :  { %276 = dma.done.wait [#allocation4], 128  }
 0x102   :  { %277 = vsyncadd [#allocation4], 4294967168 }
 0x103   :  { %149 = vsyncpa [#allocation3], 1 }
 0x104   :  { %150 = vsyncpa [#allocation6], 1 }
 0x105   :  { %151 = vsyncpa [#allocation4], 1 }

</bundles_post_ra>
